<compile_context>
chip_gen: v7x
topology: tpu7x:2x2x1
jax: 0.10.0
libtpu: 0.0.40
codegen_flags: <defaults>
</compile_context>

<pallas_src>
import functools

import jax
import jax.numpy as jnp
from jax import lax
from jax.experimental import pallas as pl
from jax.experimental.pallas import tpu as pltpu


def _ring_loss_kernel(emb_ref, r_ref, out_ref, acc_ref, *, l2_norm):
    i = pl.program_id(1)                                  # batch-tile axis ("arbitrary")

    @pl.when(i == 0)
    def _():
        acc_ref[...] = jnp.zeros_like(acc_ref)

    x = emb_ref[...].astype(jnp.float32)                  # (tile_n, D), upcast post-DMA

    if l2_norm:
        sq = jnp.sum(x * x, axis=-1, keepdims=True)       # (tile_n, 1)
        # x / max(sqrt(sq), 1e-12) == x * rsqrt(max(sq, 1e-24)): one EUP op
        # instead of sqrt + divide; all-zero rows still map to 0.
        x = x * lax.rsqrt(jnp.maximum(sq, 1e-24))

    r = r_ref[0, 0]                                       # scalar R from SMEM
    d = x - r
    # Lane-wide f32 partial: only a sublane-axis reduce in the hot loop.  The
    # cross-lane (XLU) reduce and mean/lamda scaling happen once in the wrapper.
    acc_ref[...] += jnp.sum(d * d, axis=0, keepdims=True)  # (1, D)

    @pl.when(i == pl.num_programs(1) - 1)
    def _():
        out_ref[...] = acc_ref[...]                       # per-split lane-wide partial


def ring_loss(embedding, R, *, lamda, l2_norm=True, tile_n=None, n_splits=None):
    """embedding: (N, D) array; R: scalar array (shape () or (1,)). Returns scalar loss."""
    N, D = embedding.shape
    itemsize = jnp.dtype(embedding.dtype).itemsize
    row_bytes = max(D * itemsize, 1)

    if tile_n is None:
        # ~8 MiB blocks: >=85% of HBM roofline, double-buffered working set
        # still fits v7x's 64 MiB VMEM with lots of headroom.
        target_block_bytes = 8 << 20
        tile_n = min(N, max(8, target_block_bytes // row_bytes))
        tile_n = (tile_n // 8) * 8
        while tile_n > 8 and N % tile_n != 0:             # keep the grid exact
            tile_n -= 8
        if tile_n < 8 or N % tile_n != 0:
            tile_n = N
    assert N % tile_n == 0, "batch must be divisible by tile_n for this synthetic kernel"

    n_tiles = N // tile_n
    if n_splits is None:
        # 2-way "parallel" split feeds both TensorCores on v7x; harmless on
        # single-core v5e/v6e.
        n_splits = 2 if (n_tiles >= 2 and n_tiles % 2 == 0) else 1
    assert n_tiles % n_splits == 0
    tiles_per_split = n_tiles // n_splits

    r2d = jnp.asarray(R, jnp.float32).reshape(1, 1)

    kernel = functools.partial(_ring_loss_kernel, l2_norm=bool(l2_norm))

    # Explicit VMEM budget: double-buffered input block + scratch/output slack.
    block_bytes = tile_n * D * itemsize
    vmem_limit = max(int(2 * block_bytes) + (2 << 20), 4 << 20)

    partials = pl.pallas_call(
        kernel,
        out_shape=jax.ShapeDtypeStruct((n_splits, 1, D), jnp.float32),
        grid_spec=pltpu.PrefetchScalarGridSpec(
            num_scalar_prefetch=0,
            grid=(n_splits, tiles_per_split),
            in_specs=[
                pl.BlockSpec((tile_n, D),
                             lambda s, i: (s * tiles_per_split + i, 0)),
                pl.BlockSpec((1, 1), lambda s, i: (0, 0),
                             memory_space=pltpu.SMEM),
            ],
            out_specs=pl.BlockSpec((None, 1, D), lambda s, i: (s, 0, 0)),
            scratch_shapes=[pltpu.VMEM((1, D), jnp.float32)],
        ),
        compiler_params=pltpu.CompilerParams(
            dimension_semantics=("parallel", "arbitrary"),
            vmem_limit_bytes=vmem_limit,
        ),
    )(embedding, r2d)

    # Single cross-lane reduce over per-split lane partials + final scaling
    # (mean over batch, * lamda * 0.5).
    return jnp.sum(partials) * jnp.float32(lamda * 0.5 / N)
    # TODO(synk): for very large D that cannot fit a tile even at 8 rows, add a
    # second "arbitrary" grid axis over D and accumulate x*x / x partials.


def ring_loss_ref(embedding, R, *, lamda, l2_norm=True):
    e = embedding.astype(jnp.float32)
    if l2_norm:
        norm = jnp.maximum(jnp.sqrt(jnp.sum(e * e, axis=-1, keepdims=True)), 1e-12)
        e = e / norm
    return jnp.mean(jnp.sum((e - jnp.float32(R)) ** 2, axis=1)) * lamda * 0.5


if __name__ == "__main__":
    key = jax.random.PRNGKey(0)
    k_emb, k_r = jax.random.split(key)

    N, D = 8, 32          # small synthetic shapes: batch=8, hidden=32
    lamda = 0.01

    embedding = jax.random.normal(k_emb, (N, D), dtype=jnp.float32)
    # deterministic init mimicking torch.rand(1): scalar uniform in [0, 1)
    R = jax.random.uniform(k_r, (1,), dtype=jnp.float32)

    loss = ring_loss(embedding, R, lamda=lamda, l2_norm=True)
    loss = jax.block_until_ready(loss)

    ref = ring_loss_ref(embedding, R[0], lamda=lamda, l2_norm=True)
    assert jnp.allclose(loss, ref, atol=1e-5, rtol=1e-5), (loss, ref)

    print("KERNEL_OK")
</pallas_src>

<mosaic_0001>
module attributes {stable_mosaic.version = 11 : i64} {
  func.func @_ring_loss_kernel(%arg0: i32, %arg1: i32, %arg2: memref<8x32xf32, #tpu.memory_space<vmem>>, %arg3: memref<1x1xf32, #tpu.memory_space<smem>>, %arg4: memref<1x1x32xf32, #tpu.memory_space<vmem>>, %arg5: memref<1x32xf32, #tpu.memory_space<vmem>>) attributes {dimension_semantics = [#tpu.dimension_semantics<parallel>, #tpu.dimension_semantics<arbitrary>], iteration_bounds = array<i64: 1, 1>, scalar_prefetch = 0 : i64, scratch_operands = 1 : i64, tpu.core_type = #tpu.core_type<tc>, window_params = [{transform_indices = @transform_0, window_bounds = array<i64: 8, 32>}, {transform_indices = @transform_1, window_bounds = array<i64: 1, 1>}, {transform_indices = @transform_2, window_bounds = array<i64: 1, 1, 32>}]} {
    %c0_i32 = arith.constant 0 : i32
    %0 = arith.cmpi eq, %arg1, %c0_i32 : i32
    %1 = arith.extui %0 : i1 to i32
    %c0_i32_0 = arith.constant 0 : i32
    %2 = arith.cmpi ne, %1, %c0_i32_0 : i32
    scf.if %2 {
      %cst_12 = arith.constant 0.000000e+00 : f32
      %24 = vector.broadcast %cst_12 : f32 to vector<1x32xf32>
      %c0_13 = arith.constant 0 : index
      %c0_14 = arith.constant 0 : index
      %25 = vector.load %arg5[%c0_13, %c0_14] : memref<1x32xf32, #tpu.memory_space<vmem>>, vector<1x32xf32>
      tpu.vector_store %arg5[%c0_13, %c0_14], %24 {strides = array<i32>} : memref<1x32xf32, #tpu.memory_space<vmem>>, vector<1x32xf32>,
    } else {
    }
    %c0 = arith.constant 0 : index
    %c0_1 = arith.constant 0 : index
    %3 = vector.load %arg2[%c0, %c0_1] : memref<8x32xf32, #tpu.memory_space<vmem>>, vector<8x32xf32>
    %4 = arith.mulf %3, %3 : vector<8x32xf32>
    %cst = arith.constant dense<0.000000e+00> : vector<8xf32>
    %5 = vector.multi_reduction <add>, %4, %cst [1] : vector<8x32xf32> to vector<8xf32>
    %6 = vector.shape_cast %5 : vector<8xf32> to vector<8x1xf32>
    %cst_2 = arith.constant 1.000000e-24 : f32
    %7 = vector.broadcast %cst_2 : f32 to vector<8x1xf32>
    %8 = arith.maximumf %6, %7 : vector<8x1xf32>
    %9 = math.rsqrt %8 : vector<8x1xf32>
    %10 = vector.broadcast %9 : vector<8x1xf32> to vector<8x32xf32>
    %11 = arith.mulf %3, %10 : vector<8x32xf32>
    %c0_3 = arith.constant 0 : index
    %c0_4 = arith.constant 0 : index
    %12 = memref.load %arg3[%c0_3, %c0_4] : memref<1x1xf32, #tpu.memory_space<smem>>
    %13 = vector.broadcast %12 : f32 to vector<8x32xf32>
    %14 = arith.subf %11, %13 : vector<8x32xf32>
    %c0_5 = arith.constant 0 : index
    %c0_6 = arith.constant 0 : index
    %15 = vector.load %arg5[%c0_5, %c0_6] : memref<1x32xf32, #tpu.memory_space<vmem>>, vector<1x32xf32>
    %16 = arith.mulf %14, %14 : vector<8x32xf32>
    %cst_7 = arith.constant dense<0.000000e+00> : vector<32xf32>
    %17 = vector.multi_reduction <add>, %16, %cst_7 [0] : vector<8x32xf32> to vector<32xf32>
    %18 = vector.shape_cast %17 : vector<32xf32> to vector<1x32xf32>
    %19 = arith.addf %15, %18 : vector<1x32xf32>
    %c0_8 = arith.constant 0 : index
    %c0_9 = arith.constant 0 : index
    %20 = vector.load %arg5[%c0_8, %c0_9] : memref<1x32xf32, #tpu.memory_space<vmem>>, vector<1x32xf32>
    tpu.vector_store %arg5[%c0_8, %c0_9], %19 {strides = array<i32>} : memref<1x32xf32, #tpu.memory_space<vmem>>, vector<1x32xf32>,
    %c0_i32_10 = arith.constant 0 : i32
    %21 = arith.cmpi eq, %arg1, %c0_i32_10 : i32
    %22 = arith.extui %21 : i1 to i32
    %c0_i32_11 = arith.constant 0 : i32
    %23 = arith.cmpi ne, %22, %c0_i32_11 : i32
    scf.if %23 {
      %c0_12 = arith.constant 0 : index
      %c0_13 = arith.constant 0 : index
      %24 = vector.load %arg5[%c0_12, %c0_13] : memref<1x32xf32, #tpu.memory_space<vmem>>, vector<1x32xf32>
      %c0_14 = arith.constant 0 : index
      %c0_15 = arith.constant 0 : index
      %c0_16 = arith.constant 0 : index
      %25 = vector.load %arg4[%c0_14, %c0_15, %c0_16] : memref<1x1x32xf32, #tpu.memory_space<vmem>>, vector<1x1x32xf32>
      %26 = vector.shape_cast %25 : vector<1x1x32xf32> to vector<1x32xf32>
      %27 = vector.shape_cast %24 : vector<1x32xf32> to vector<1x1x32xf32>
      tpu.vector_store %arg4[%c0_14, %c0_15, %c0_16], %27 {strides = array<i32>} : memref<1x1x32xf32, #tpu.memory_space<vmem>>, vector<1x1x32xf32>,
    } else {
    }
    return
  }
  func.func @transform_0(%arg0: i32, %arg1: i32) -> (i32, i32) {
    %c1_i32 = arith.constant 1 : i32
    %0 = arith.muli %arg0, %c1_i32 : i32
    %1 = arith.addi %0, %arg1 : i32
    %c0_i32 = arith.constant 0 : i32
    %c0_i32_0 = arith.constant 0 : i32
    return %1, %c0_i32 : i32, i32
  }
  func.func @transform_1(%arg0: i32, %arg1: i32) -> (i32, i32) {
    %c0_i32 = arith.constant 0 : i32
    %c0_i32_0 = arith.constant 0 : i32
    %c0_i32_1 = arith.constant 0 : i32
    return %c0_i32, %c0_i32_0 : i32, i32
  }
  func.func @transform_2(%arg0: i32, %arg1: i32) -> (i32, i32, i32) {
    %c0_i32 = arith.constant 0 : i32
    %c0_i32_0 = arith.constant 0 : i32
    %c0_i32_1 = arith.constant 0 : i32
    return %arg0, %c0_i32, %c0_i32_0 : i32, i32, i32
  }
}

</mosaic_0001>

<bundles_post_ra>
// kernel: tpu_custom_call.1
= control target key start
LH: loop header
LB: loop body
LE: loop exit
PB: predicated region body
PF: predicated region fallthrough
CT: control target
= control target key end

     0   :  { %8 = vsyncpa [#allocation5], 0  ;;  %s180_s0 = inlined_call_operand.hbm [shape: f32[8,32], index: 0, kind: input, shape index: {}]   ;;  %s181_s1 = inlined_call_operand.<no memory space> [shape: f32[1,1], index: 1, kind: input, shape index: {}]   ;;  %s182_s2 = inlined_call_operand.hbm [shape: f32[1,1,32], index: 2, kind: output, shape index: {}]  }
   0x1   :  { %9 = vsyncpa [#allocation6], 0  ;;  %s132_s9 = smov [#allocation4]   ;;  %s84_s13 = scalar_lea.hbm %s180_s0, 128 }
   0x2   :  { %s19_s10 = sshll.u32 %s132_s9, 4  ;;  %p85_p0 = scmp.ne.s32.totalorder %s180_s0, %s84_s13  ;;  %s20_s10 = int_to_ptr.vmem [resolvable:$true] %s19_s10 }
   0x3   :  { %p88_p1 = scmp.lt.u32.totalorder %s84_s13, %s180_s0 }
   0x5   :  { %p90_p2 = pnand %p88_p1, %p85_p0 }
   0x7   :  { %93 = shalt.err (!%p90_p2)
}
   0x8   :  { %s94_s18 = scalar_lea.vmem %s20_s10, 128  ;;  %p99_p4 = scmp.lt.s32.totalorder %s20_s10, %s20_s10 }
   0x9   :  { %p95_p3 = scmp.ne.s32.totalorder %s20_s10, %s94_s18  ;;  %p100_p5 = scmp.lt.s32.totalorder %s94_s18, %s94_s18 }
   0xb   :  { %p101_p6 = por %p100_p5, %p99_p4 }
   0xd   :  { %p102_p7 = pnand %p101_p6, %p95_p3 }
   0xf   :  { %105 = shalt.err (!%p102_p7)
}
  0x10   :  { %22 = dma.hbm_to_vmem [thread:$0]  %s180_s0, 128, %s20_s10, [#allocation5]  }
  0x11   :  { %128 = dma.done.wait [#allocation5], 128  }
  0x12   :  { %129 = vsyncadd [#allocation5], 4294967168  ;;  %v35_v0 = vld [vmem:[#allocation4] sm:$0xff]  ;;  %vm37_vm0 = vcmask 261120   ;;  %vm33_vm1 = vcmask 253952   ;;  %v133_v3 = vmov 0.0   ;;  %v45_v7 = vstv %s181_s1 }
  0x13   :  { %v36_v1 = vmul.f32 %v35_v0, %v35_v0  ;;  %34 = vst.msk [vmem:[#allocation2] sm:$0x1] %vm33_vm1, %v133_v3  ;;  %s134_s0 = smov [#allocation7]  }
  0x14   :  { %s70_s23 = sshll.u32 %s134_s0, 4  ;;  %s71_s23 = int_to_ptr.vmem [resolvable:$true] %s70_s23 }
  0x15   :  { %v38_v2 = vsel %vm37_vm0, %v36_v1, 0.0  ;;  %s106_s1 = scalar_lea.vmem %s71_s23, 16  ;;  %s110_s24 = scalar_lea.vmem %s71_s23, 32 }
  0x16   :  { %39 = vadd.xlane.f32.xlu0 %v38_v2  ;;  %p107_p8 = scmp.ne.s32.totalorder %s71_s23, %s106_s1  ;;  %p111_p9 = scmp.lt.s32.totalorder %s71_s23, %s71_s23 }
  0x17   :  { %p112_p10 = scmp.lt.s32.totalorder %s110_s24, %s106_s1 }
  0x19   :  { %p113_p11 = por %p112_p10, %p111_p9 }
  0x1a   :  { %v47_v17 = vld [vmem:[#allocation2] sm:$0x1] }
  0x1b   :  { %p114_p12 = pnand %p113_p11, %p107_p8 }
  0xa3   :  { %v40_v4 = vpop.xlane.xlu0 %39 }
  0xa4   :  { %v41_v5 = vmax.f32 %v40_v4, 1e-24 }
  0xa6   :  { %82 = vrsqrt.f32 %v41_v5 }
  0xb0   :  { %v83_v6 = vpop.eup %82 }
  0xb1   :  { %v43_v8 = vmul.f32 %v83_v6, %v35_v0 }
  0xb3   :  { %v46_v9 = vsub.f32 %v43_v8, %v45_v7 }
  0xb5   :  { %v48_v10 = vmul.f32 %v46_v9, %v46_v9 }
  0xb7   :  { %v49_v11 = vsel %vm37_vm0, %v48_v10, 0.0 }
  0xb8   :  { %v50_v12 = vrot.slane %v49_v11, 4 }
  0xba   :  { %v51_v13 = vadd.f32 %v50_v12, %v49_v11 }
  0xbc   :  { %v52_v14 = vrot.slane %v51_v13, 2 }
  0xbe   :  { %v53_v15 = vadd.f32 %v52_v14, %v51_v13 }
  0xc0   :  { %v54_v16 = vrot.slane %v53_v15, 1 }
  0xc2   :  { %v55_v18 = vadd.f32 %v54_v16, %v53_v15 }
  0xc4   :  { %v56_v19 = vadd.f32 %v55_v18, %v47_v17 }
  0xc6   :  { %58 = vst.msk [vmem:[#allocation2] sm:$0x1] %vm33_vm1, %v56_v19 }
  0xcd   :  { %v62_v20 = vld [vmem:[#allocation2] sm:$0x1] }
  0xce   :  { %63 = vst.msk [vmem:[#allocation7] sm:$0x1] %vm33_vm1, %v62_v20 }
  0xcf   :  { %117 = shalt.err (!%p114_p12)
}
  0xd0   :  { %s118_s27 = scalar_lea.hbm %s182_s2, 16 }
  0xd1   :  { %p119_p13 = scmp.ne.s32.totalorder %s182_s2, %s118_s27  ;;  %p122_p0 = scmp.lt.u32.totalorder %s118_s27, %s182_s2 }
  0xd3   :  { %p124_p1 = pnand %p122_p0, %p119_p13 }
  0xd5   :  { %127 = shalt.err (!%p124_p1)
}
  0xd6   :  { %73 = dma.vmem_to_hbm [thread:$0]  %s71_s23, 16, %s182_s2, [#allocation6]  }
  0xd7   :  { %130 = dma.done.wait [#allocation6], 16  }
  0xd8   :  { %131 = vsyncadd [#allocation6], 4294967280 }
  0xd9   :  { %77 = vsyncpa [#allocation5], 1 }
  0xda   :  { %78 = vsyncpa [#allocation6], 1 }

</bundles_post_ra>
